<compile_context>
chip_gen: v5e
topology: v5e:2x2
jax: 0.10.0
libtpu: 0.0.40
codegen_flags: <defaults>
</compile_context>

<pallas_src>
import jax
import jax.numpy as jnp
from jax.experimental import pallas as pl
from jax.experimental.pallas import tpu as pltpu

BN_EPS = 1e-5
LANE = 128


def _round_up(x, m):
    return (x + m - 1) // m * m


# ----------------------------------------------------------------------------
# Kernel
# ----------------------------------------------------------------------------
def _make_mlp_kernel(num_hidden_layers):
    """Fused MLP kernel: (dot + bias + ReLU) x L  ->  dot + bias.

    Ref order: x, (w_i, b_i) for i = 0..L-1, w_out, b_out, out_ref.
    Weights are bf16, biases are f32 [1, N]; accumulation is f32.
    """

    def kernel(*refs):
        x_ref = refs[0]
        out_ref = refs[-1]
        p = refs[1:-1]

        h = x_ref[...]                                     # bf16 [TB, E+C]
        idx = 0
        for _ in range(num_hidden_layers):
            w_ref, b_ref = p[idx], p[idx + 1]
            idx += 2
            h = jnp.dot(h, w_ref[...], preferred_element_type=jnp.float32)
            h = jnp.maximum(h + b_ref[...], 0.0)           # bias + ReLU in f32
            # TODO(synk): Dropout is identity in eval mode; training-mode
            # stochastic dropout is not implemented.
            h = h.astype(jnp.bfloat16)                     # cast only for next dot
        wo_ref, bo_ref = p[idx], p[idx + 1]
        out = jnp.dot(h, wo_ref[...], preferred_element_type=jnp.float32)
        out_ref[...] = (out + bo_ref[...]).astype(out_ref.dtype)

    return kernel


# ----------------------------------------------------------------------------
# Wrapper-side parameter prep (BN folding + lane-dense padding)
# ----------------------------------------------------------------------------
def _fold_bn(gamma, beta, mean, var):
    scale = gamma / jnp.sqrt(var + BN_EPS)
    shift = beta - mean * scale
    return scale, shift


def _prepare_folded_weights(params, emb_size):
    """Fold every eval-mode BatchNorm1d into the adjacent Linear (exact)."""
    hidden = params["hidden"]
    E = emb_size
    Ws, bs = [], []

    # Layer 0: fold bn_cont into the continuous rows of W0 and into b0.
    W0, b0 = hidden[0]["w"], hidden[0]["b"]
    s0, t0 = _fold_bn(*params["bn_cont"])
    Ws.append(jnp.concatenate([W0[:E], s0[:, None] * W0[E:]], axis=0))
    bs.append(b0 + t0 @ W0[E:])

    # Layer i (i >= 1): fold layer (i-1)'s post-ReLU BN into W_i / b_i.
    for i in range(1, len(hidden)):
        W, b = hidden[i]["w"], hidden[i]["b"]
        s, t = _fold_bn(*hidden[i - 1]["bn"])
        Ws.append(s[:, None] * W)
        bs.append(b + t @ W)

    # Output layer: fold the last hidden layer's BN into w_out / b_out.
    s, t = _fold_bn(*hidden[-1]["bn"])
    Ws.append(s[:, None] * params["w_out"])
    bs.append(params["b_out"] + t @ params["w_out"])
    return Ws, bs


def _pad_lane_dense(Ws, bs):
    """Zero-pad every weight's output dim (and the next weight's input dim)
    to a multiple of 128 so matmul N and all stores are lane-dense (exact:
    padded columns get zero bias -> zero activation -> zero contribution)."""
    padded_W, padded_b = [], []
    in_dim = Ws[0].shape[0]                  # layer-0 contraction dim (unpadded)
    for W, b in zip(Ws, bs):
        fi, fo = W.shape
        fo_p = _round_up(fo, LANE)
        W_p = jnp.zeros((in_dim, fo_p), W.dtype).at[:fi, :fo].set(W)
        b_p = jnp.zeros((fo_p,), b.dtype).at[:fo].set(b)
        padded_W.append(W_p)
        padded_b.append(b_p)
        in_dim = fo_p
    return padded_W, padded_b


# ----------------------------------------------------------------------------
# Forward
# ----------------------------------------------------------------------------
def mlp_forward(params, x_cat, x_cont, *, batch_tile=128):
    """JAX wrapper mirroring MLP.forward(x_cat, x_cont) in eval mode.

    batch_tile must be a multiple of 16 (bf16 sublane packing)."""
    # --- glue: embedding lookups (ConcatenatedEmbeddings; dropout = identity) ---
    emb_cols = [jnp.take(tbl, x_cat[:, i], axis=0)
                for i, tbl in enumerate(params["emb_tables"])]
    x_emb = jnp.concatenate(emb_cols, axis=1).astype(jnp.float32)
    E = x_emb.shape[1]

    # --- glue: fold BatchNorms into the Linears, pad output dims lane-dense ---
    Ws, bs = _prepare_folded_weights(params, E)
    Ws, bs = _pad_lane_dense(Ws, bs)

    num_hidden = len(params["hidden"])
    num_classes = params["w_out"].shape[1]

    # Single fused input x = [x_emb | x_cont] (bn_cont already folded into W0).
    x = jnp.concatenate([x_emb, x_cont.astype(jnp.float32)], axis=1)
    B, K_in = x.shape

    TB = min(batch_tile, _round_up(B, 16))
    B_pad = _round_up(B, TB)
    x = jnp.pad(x, ((0, B_pad - B), (0, 0))).astype(jnp.bfloat16)

    # bf16 matmul operands (f32 accumulation in-kernel); biases stay f32 [1, N].
    Ws_bf16 = [w.astype(jnp.bfloat16) for w in Ws]
    bs_f32 = [b[None, :].astype(jnp.float32) for b in bs]

    kernel_args = [x]
    for w, b in zip(Ws_bf16, bs_f32):
        kernel_args += [w, b]

    N_out = Ws_bf16[-1].shape[1]             # padded output lanes (x128)
    grid = (B_pad // TB,)

    # x / out stream over the batch grid; weights/biases keep a constant
    # index_map so the pipeline keeps them resident across grid steps.
    in_specs = [pl.BlockSpec((TB, K_in), lambda i: (i, 0))]
    for arg in kernel_args[1:]:
        in_specs.append(pl.BlockSpec(arg.shape, lambda i: (0, 0)))
    out_specs = pl.BlockSpec((TB, N_out), lambda i: (i, 0))

    flops = 2 * B_pad * sum(w.shape[0] * w.shape[1] for w in Ws_bf16)
    bytes_accessed = (x.size * x.dtype.itemsize
                      + sum(a.size * a.dtype.itemsize for a in kernel_args[1:])
                      + B_pad * N_out * 4)

    out = pl.pallas_call(
        _make_mlp_kernel(num_hidden),
        out_shape=jax.ShapeDtypeStruct((B_pad, N_out), jnp.float32),
        grid=grid,
        in_specs=in_specs,
        out_specs=out_specs,
        compiler_params=pltpu.CompilerParams(
            dimension_semantics=("parallel",),
            vmem_limit_bytes=64 * 1024 * 1024),
        cost_estimate=pl.CostEstimate(
            flops=int(flops), transcendentals=0,
            bytes_accessed=int(bytes_accessed)),
    )(*kernel_args)

    # Slice away batch padding and the zero-padded output lanes.
    return out[:B, :num_classes]


# ----------------------------------------------------------------------------
# Pure-JAX reference (original eval-mode semantics, f32, no folding)
# ----------------------------------------------------------------------------
def mlp_reference(params, x_cat, x_cont):
    emb_cols = [jnp.take(tbl, x_cat[:, i], axis=0)
                for i, tbl in enumerate(params["emb_tables"])]
    x_emb = jnp.concatenate(emb_cols, axis=1).astype(jnp.float32)

    s, b = _fold_bn(*params["bn_cont"])
    xc = x_cont.astype(jnp.float32) * s[None, :] + b[None, :]
    x = jnp.concatenate([x_emb, xc], axis=1)

    for l in params["hidden"]:
        x = x @ l["w"] + l["b"][None, :]
        x = jnp.maximum(x, 0.0)
        s, b = _fold_bn(*l["bn"])
        x = x * s[None, :] + b[None, :]
    return x @ params["w_out"] + params["b_out"][None, :]


# ----------------------------------------------------------------------------
# Deterministic synthetic parameters (matches the torch module shapes)
# ----------------------------------------------------------------------------
def init_params(key, embedding_table_shapes, num_continuous,
                layer_hidden_dims, num_classes):
    keys = iter(jax.random.split(key, 64))
    params = {}

    params["emb_tables"] = [
        jax.random.normal(next(keys), (card, emb), dtype=jnp.float32) * 0.1
        for (card, emb) in embedding_table_shapes.values()
    ]
    emb_size = sum(e for _, e in embedding_table_shapes.values())

    def bn_params(k, n):
        k1, k2, k3 = jax.random.split(k, 3)
        gamma = 1.0 + 0.1 * jax.random.normal(k1, (n,), dtype=jnp.float32)
        beta = 0.1 * jax.random.normal(k2, (n,), dtype=jnp.float32)
        mean = 0.1 * jax.random.normal(k3, (n,), dtype=jnp.float32)
        var = jnp.ones((n,), dtype=jnp.float32) * 0.9
        return (gamma, beta, mean, var)

    params["bn_cont"] = bn_params(next(keys), num_continuous)

    layer_in = [emb_size + num_continuous] + list(layer_hidden_dims[:-1])
    layer_out = list(layer_hidden_dims)
    hidden = []
    for fi, fo in zip(layer_in, layer_out):
        w = jax.random.normal(next(keys), (fi, fo), dtype=jnp.float32) / jnp.sqrt(fi)
        b = 0.01 * jax.random.normal(next(keys), (fo,), dtype=jnp.float32)
        hidden.append({"w": w, "b": b, "bn": bn_params(next(keys), fo)})
    params["hidden"] = hidden

    fi, fo = layer_hidden_dims[-1], num_classes
    params["w_out"] = jax.random.normal(next(keys), (fi, fo),
                                        dtype=jnp.float32) / jnp.sqrt(fi)
    params["b_out"] = 0.01 * jax.random.normal(next(keys), (fo,),
                                               dtype=jnp.float32)
    return params


if __name__ == "__main__":
    key = jax.random.PRNGKey(0)
    k_params, k_cat0, k_cat1, k_cont = jax.random.split(key, 4)

    # Small, module-consistent config (batch chosen to exercise the 2-step grid).
    embedding_table_shapes = {"cat_a": (10, 8), "cat_b": (20, 8)}   # E = 16
    num_continuous = 16
    layer_hidden_dims = [64, 32]
    num_classes = 8
    batch = 256

    params = init_params(k_params, embedding_table_shapes, num_continuous,
                         layer_hidden_dims, num_classes)

    x_cat = jnp.stack(
        [jax.random.randint(k_cat0, (batch,), 0, 10, dtype=jnp.int32),
         jax.random.randint(k_cat1, (batch,), 0, 20, dtype=jnp.int32)],
        axis=1)                                              # [256, 2] int32
    x_cont = jax.random.normal(k_cont, (batch, num_continuous),
                               dtype=jnp.float32)            # [256, 16] f32

    out = mlp_forward(params, x_cat, x_cont, batch_tile=128)
    out = jax.block_until_ready(out)

    ref = mlp_reference(params, x_cat, x_cont)
    assert out.shape == (batch, num_classes)
    # bf16 matmul operands + BN folding reassociation shift results slightly
    # vs the f32 reference; 5e-2 gives comfortable margin at these dims.
    max_err = float(jnp.max(jnp.abs(out - ref)))
    assert jnp.allclose(out, ref, atol=5e-2, rtol=5e-2), (
        f"mismatch vs reference (max abs err {max_err:.4e})")

    print("KERNEL_OK")
</pallas_src>

<mosaic_0001>
module attributes {stable_mosaic.version = 11 : i64} {
  func.func @kernel(%arg0: i32, %arg1: memref<128x32xbf16, #tpu.memory_space<vmem>>, %arg2: memref<32x128xbf16, #tpu.memory_space<vmem>>, %arg3: memref<1x128xf32, #tpu.memory_space<vmem>>, %arg4: memref<128x128xbf16, #tpu.memory_space<vmem>>, %arg5: memref<1x128xf32, #tpu.memory_space<vmem>>, %arg6: memref<128x128xbf16, #tpu.memory_space<vmem>>, %arg7: memref<1x128xf32, #tpu.memory_space<vmem>>, %arg8: memref<128x128xf32, #tpu.memory_space<vmem>>) attributes {dimension_semantics = [#tpu.dimension_semantics<parallel>], iteration_bounds = array<i64: 2>, scalar_prefetch = 0 : i64, scratch_operands = 0 : i64, tpu.core_type = #tpu.core_type<tc>, window_params = [{transform_indices = @transform_0, window_bounds = array<i64: 128, 32>}, {pipeline_mode = #tpu.pipeline_mode<synchronous>, transform_indices = @transform_1, window_bounds = array<i64: 32, 128>}, {pipeline_mode = #tpu.pipeline_mode<synchronous>, transform_indices = @transform_2, window_bounds = array<i64: 1, 128>}, {pipeline_mode = #tpu.pipeline_mode<synchronous>, transform_indices = @transform_3, window_bounds = array<i64: 128, 128>}, {pipeline_mode = #tpu.pipeline_mode<synchronous>, transform_indices = @transform_4, window_bounds = array<i64: 1, 128>}, {pipeline_mode = #tpu.pipeline_mode<synchronous>, transform_indices = @transform_5, window_bounds = array<i64: 128, 128>}, {pipeline_mode = #tpu.pipeline_mode<synchronous>, transform_indices = @transform_6, window_bounds = array<i64: 1, 128>}, {transform_indices = @transform_7, window_bounds = array<i64: 128, 128>}]} {
    %c0 = arith.constant 0 : index
    %c0_0 = arith.constant 0 : index
    %0 = vector.load %arg1[%c0, %c0_0] : memref<128x32xbf16, #tpu.memory_space<vmem>>, vector<128x32xbf16>
    %c0_1 = arith.constant 0 : index
    %c0_2 = arith.constant 0 : index
    %1 = vector.load %arg2[%c0_1, %c0_2] : memref<32x128xbf16, #tpu.memory_space<vmem>>, vector<32x128xbf16>
    %cst = arith.constant dense<0.000000e+00> : vector<128x128xf32>
    %2 = tpu.matmul %0, %1, %cst {dimension_numbers = #tpu.dot_dimension_numbers<[1], [0], [0], [1], [0, 0, 1, 1], [], []>} : vector<128x32xbf16>, vector<32x128xbf16>, vector<128x128xf32> -> vector<128x128xf32>
    %c0_3 = arith.constant 0 : index
    %c0_4 = arith.constant 0 : index
    %3 = vector.load %arg3[%c0_3, %c0_4] : memref<1x128xf32, #tpu.memory_space<vmem>>, vector<1x128xf32>
    %4 = vector.broadcast %3 : vector<1x128xf32> to vector<128x128xf32>
    %5 = arith.addf %2, %4 : vector<128x128xf32>
    %cst_5 = arith.constant 0.000000e+00 : f32
    %6 = vector.broadcast %cst_5 : f32 to vector<128x128xf32>
    %7 = arith.maximumf %5, %6 : vector<128x128xf32>
    %8 = arith.truncf %7 : vector<128x128xf32> to vector<128x128xbf16>
    %c0_6 = arith.constant 0 : index
    %c0_7 = arith.constant 0 : index
    %9 = vector.load %arg4[%c0_6, %c0_7] : memref<128x128xbf16, #tpu.memory_space<vmem>>, vector<128x128xbf16>
    %cst_8 = arith.constant dense<0.000000e+00> : vector<128x128xf32>
    %10 = tpu.matmul %8, %9, %cst_8 {dimension_numbers = #tpu.dot_dimension_numbers<[1], [0], [0], [1], [0, 0, 1, 1], [], []>} : vector<128x128xbf16>, vector<128x128xbf16>, vector<128x128xf32> -> vector<128x128xf32>
    %c0_9 = arith.constant 0 : index
    %c0_10 = arith.constant 0 : index
    %11 = vector.load %arg5[%c0_9, %c0_10] : memref<1x128xf32, #tpu.memory_space<vmem>>, vector<1x128xf32>
    %12 = vector.broadcast %11 : vector<1x128xf32> to vector<128x128xf32>
    %13 = arith.addf %10, %12 : vector<128x128xf32>
    %cst_11 = arith.constant 0.000000e+00 : f32
    %14 = vector.broadcast %cst_11 : f32 to vector<128x128xf32>
    %15 = arith.maximumf %13, %14 : vector<128x128xf32>
    %16 = arith.truncf %15 : vector<128x128xf32> to vector<128x128xbf16>
    %c0_12 = arith.constant 0 : index
    %c0_13 = arith.constant 0 : index
    %17 = vector.load %arg6[%c0_12, %c0_13] : memref<128x128xbf16, #tpu.memory_space<vmem>>, vector<128x128xbf16>
    %cst_14 = arith.constant dense<0.000000e+00> : vector<128x128xf32>
    %18 = tpu.matmul %16, %17, %cst_14 {dimension_numbers = #tpu.dot_dimension_numbers<[1], [0], [0], [1], [0, 0, 1, 1], [], []>} : vector<128x128xbf16>, vector<128x128xbf16>, vector<128x128xf32> -> vector<128x128xf32>
    %c0_15 = arith.constant 0 : index
    %c0_16 = arith.constant 0 : index
    %19 = vector.load %arg7[%c0_15, %c0_16] : memref<1x128xf32, #tpu.memory_space<vmem>>, vector<1x128xf32>
    %20 = vector.broadcast %19 : vector<1x128xf32> to vector<128x128xf32>
    %21 = arith.addf %18, %20 : vector<128x128xf32>
    %c0_17 = arith.constant 0 : index
    %c0_18 = arith.constant 0 : index
    %22 = vector.load %arg8[%c0_17, %c0_18] : memref<128x128xf32, #tpu.memory_space<vmem>>, vector<128x128xf32>
    tpu.vector_store %arg8[%c0_17, %c0_18], %21 {strides = array<i32>} : memref<128x128xf32, #tpu.memory_space<vmem>>, vector<128x128xf32>,
    return
  }
  func.func @transform_0(%arg0: i32) -> (i32, i32) {
    %c0_i32 = arith.constant 0 : i32
    %c0_i32_0 = arith.constant 0 : i32
    return %arg0, %c0_i32 : i32, i32
  }
  func.func @transform_1(%arg0: i32) -> (i32, i32) {
    %c0_i32 = arith.constant 0 : i32
    %c0_i32_0 = arith.constant 0 : i32
    %c0_i32_1 = arith.constant 0 : i32
    return %c0_i32, %c0_i32_0 : i32, i32
  }
  func.func @transform_2(%arg0: i32) -> (i32, i32) {
    %c0_i32 = arith.constant 0 : i32
    %c0_i32_0 = arith.constant 0 : i32
    %c0_i32_1 = arith.constant 0 : i32
    return %c0_i32, %c0_i32_0 : i32, i32
  }
  func.func @transform_3(%arg0: i32) -> (i32, i32) {
    %c0_i32 = arith.constant 0 : i32
    %c0_i32_0 = arith.constant 0 : i32
    %c0_i32_1 = arith.constant 0 : i32
    return %c0_i32, %c0_i32_0 : i32, i32
  }
  func.func @transform_4(%arg0: i32) -> (i32, i32) {
    %c0_i32 = arith.constant 0 : i32
    %c0_i32_0 = arith.constant 0 : i32
    %c0_i32_1 = arith.constant 0 : i32
    return %c0_i32, %c0_i32_0 : i32, i32
  }
  func.func @transform_5(%arg0: i32) -> (i32, i32) {
    %c0_i32 = arith.constant 0 : i32
    %c0_i32_0 = arith.constant 0 : i32
    %c0_i32_1 = arith.constant 0 : i32
    return %c0_i32, %c0_i32_0 : i32, i32
  }
  func.func @transform_6(%arg0: i32) -> (i32, i32) {
    %c0_i32 = arith.constant 0 : i32
    %c0_i32_0 = arith.constant 0 : i32
    %c0_i32_1 = arith.constant 0 : i32
    return %c0_i32, %c0_i32_0 : i32, i32
  }
  func.func @transform_7(%arg0: i32) -> (i32, i32) {
    %c0_i32 = arith.constant 0 : i32
    %c0_i32_0 = arith.constant 0 : i32
    return %arg0, %c0_i32 : i32, i32
  }
}

</mosaic_0001>

<bundles_post_ra>
// kernel: tpu_custom_call.1
= control target key start
LH: loop header
LB: loop body
LE: loop exit
PB: predicated region body
PF: predicated region fallthrough
CT: control target
= control target key end

     0   :  { %12 = vsyncpa [#allocation3], 0  ;;  %s1330_s0 = inlined_call_operand.vmem [shape: bf16[256,32], index: 0, kind: input, shape index: {}]   ;;  %s1331_s1 = inlined_call_operand.vmem [shape: bf16[32,128], index: 1, kind: input, shape index: {}]   ;;  %s1332_s2 = inlined_call_operand.vmem [shape: f32[1,128], index: 2, kind: input, shape index: {}]   ;;  %s1333_s3 = inlined_call_operand.vmem [shape: bf16[128,128], index: 3, kind: input, shape index: {}]   ;;  %s1334_s4 = inlined_call_operand.vmem [shape: f32[1,128], index: 4, kind: input, shape index: {}]   ;;  %s1335_s5 = inlined_call_operand.vmem [shape: bf16[128,128], index: 5, kind: input, shape index: {}]   ;;  %s1336_s6 = inlined_call_operand.vmem [shape: f32[1,128], index: 6, kind: input, shape index: {}]   ;;  %s1337_s7 = inlined_call_operand.hbm [shape: f32[256,128], index: 7, kind: output, shape index: {}]  }
   0x1   :  { %14 = vsyncpa [#allocation3 + $0x1], 0  ;;  %s1124_s24 = smov 0   ;;  %s1126_s25 = smov 0  }
   0x2   :  { %s1128_s26 = smov 0   ;;  %s1130_s27 = smov 0  }
   0x3 LB: > { %s1145_s28 = sadd.s32 4294967295, %s1080_s27   ;;  %s807_s29 = sadd.s32 4294967294, %s1080_s27   ;;  %s1080_s27 = sphi %s1130_s27, %s1343_s27   ;;  %s1076_s26 = sphi %s1128_s26, %s1342_s26   ;;  %s1072_s25 = sphi %s1126_s25, %s1341_s25   ;;  %s1068_s24 = sphi %s1124_s24, %s1340_s24  }
   0x4   : > { %s1149_s30 = sadd.s32 1, %s1080_s27   ;;  %s179_s8 = sadd.s32 1, %s1076_s26 }
   0x5   : > { %s176_s9 = ssub.s32 %s1080_s27, %s1149_s30  ;;  %p189_p0 = scmp.ne.s32.totalorder %s1076_s26, %s1072_s25 }
   0x6   : > { %p177_p1 = scmp.eq.s32.totalorder %s176_s9, 0  ;;  %p190_p2 = scmp.eq.s32.totalorder %s1145_s28, 1 }
   0x7   : > { %p195_p3 = scmp.ne.s32.totalorder %s1072_s25, %s1068_s24  ;;  %p196_p4 = scmp.eq.s32.totalorder %s807_s29, 1 }
   0x8   : > { %s1160_s10 = scalar_select %p177_p1, %s1076_s26, %s179_s8  }
   0x9   : > { %p1162_p5 = por %p190_p2, %p189_p0  ;;  %p1166_p6 = por %p196_p4, %p195_p3 }
   0xa   : > { %p810_p7 = scmp.ge.s32.totalorder %s1080_s27, 1  ;;  %p241_p8 = scmp.lt.s32.totalorder %s1080_s27, 3 }
   0xc   : > { %p242_p9 = pnand %p810_p7, %p241_p8 }
   0xd   : > { %s812_s15 = sshll.u32 (!%p242_p9), %s1145_s28, 4  ;;  %s270_s16 = sand.u32 (!%p242_p9), 1, %s1072_s25  }
   0xe   : > { %245 = sbr.rel (%p242_p9) target bundleno = 571 (0x23b), region = 48  ;;  %p274_p10 = scmp.lt.s32.totalorder (!%p242_p9), %s812_s15, 31 }
   0xf   : > { %s811_s17 = sshll.u32 (!%p242_p9), %s270_s16, 7  ;;  %s957_s22 = sshll.u32 (!%p242_p9), %s1145_s28, 7 }
  0x10   : > { %s1278_s20 = scalar_lea.vmem (!%p242_p9), [#allocation2], %s811_s17  ;;  %s741_s8 = scalar_lea.hbm (!%p242_p9), %s1337_s7, %s957_s22 }
  0x11   : > { %s742_s9 = sshll.u32 (!%p242_p9), %s1278_s20, 4  ;;  %s730_s13 = scalar_lea.sflag (!%p242_p9), [#allocation3], %s270_s16  ;;  %s743_s9 = int_to_ptr.vmem [resolvable:$true] %s742_s9 }
  0x13   : > { %v940_v0 = vld [vmem:[%s1331_s1 + $0x8] sm:$0xff]  ;;  %v939_v1 = vld [vmem:[%s1331_s1] sm:$0xff]  ;;  %s1345_s15 = smov (!%p274_p10, %s812_s15), 31  ;;  %vm357_vm0 = vcmask 261120   ;;  %v948_v7 = vld [vmem:[%s1333_s3 + $0x38] sm:$0xff] }
  0x14   : > { %388 = vmatpush.bf16.msra.mxu0 %v940_v0  ;;  %s813_s18 = sshll.u32 %s1345_s15, 2  ;;  %523 = vmatpush.bf16.msra.mxu1 %v948_v7  ;;  %v947_v9 = vld [vmem:[%s1333_s3 + $0x30] sm:$0xff]  ;;  %v946_v10 = vld [vmem:[%s1333_s3 + $0x28] sm:$0xff]  ;;  %v945_v11 = vld [vmem:[%s1333_s3 + $0x20] sm:$0xff] }
  0x15   : > { %s1182_s21 = scalar_lea.vmem %s1330_s0, %s813_s18  ;;  %958 = vmatpush.bf16.msra.mxu3 %v948_v7  ;;  %v944_v12 = vld [vmem:[%s1333_s3 + $0x18] sm:$0xff]  ;;  %v943_v14 = vld [vmem:[%s1333_s3 + $0x10] sm:$0xff]  ;;  %v942_v15 = vld [vmem:[%s1333_s3 + $0x8] sm:$0xff]  ;;  %s1038_s18 = scalar_lea.hbm %s1337_s7, 256 }
  0x16   : > { %v931_v2 = vld [vmem:[%s1182_s21] sm:$0xff]  ;;  %v932_v3 = vld [vmem:[%s1182_s21 + $0x8] sm:$0xff]  ;;  %v933_v4 = vld [vmem:[%s1182_s21 + $0x10] sm:$0xff] }
  0x17   : > { %v934_v5 = vld [vmem:[%s1182_s21 + $0x18] sm:$0xff]  ;;  %v935_v6 = vld [vmem:[%s1182_s21 + $0x20] sm:$0xff]  ;;  %v936_v8 = vld [vmem:[%s1182_s21 + $0x28] sm:$0xff] }
  0x18   : > { %389 = vmatpush.bf16.msra.mxu0 %v939_v1  ;;  %524 = vmatpush.bf16.msra.mxu1 %v947_v9  ;;  %v937_v13 = vld [vmem:[%s1182_s21 + $0x30] sm:$0xff]  ;;  %v941_v16 = vld [vmem:[%s1333_s3] sm:$0xff]  ;;  %v938_v17 = vld [vmem:[%s1182_s21 + $0x38] sm:$0xff]  ;;  %s744_s21 = sshll.u32 %s741_s8, 4  ;;  %s745_s21 = int_to_ptr.hbm [resolvable:$true] %s744_s21 }
  0x19   : > { %959 = vmatpush.bf16.msra.mxu3 %v947_v9  ;;  %v1227_v19 = vld [vmem:[%s1332_s2] ss:$0 sm:$0xff]  ;;  %v956_v58 = vld [vmem:[%s1335_s5 + $0x38] sm:$0xff]  ;;  %v955_v62 = vld [vmem:[%s1335_s5 + $0x30] sm:$0xff]  ;;  %s1032_s14 = sshra.s32 %s745_s21, 4  ;;  %s1033_s14 = int_to_ptr.hbm [resolvable:$true] %s1032_s14 }
  0x1a   : > { %664 = vmatpush.bf16.msra.mxu2 %v956_v58  ;;  %v954_v0 = vld [vmem:[%s1335_s5 + $0x28] sm:$0xff]  ;;  %v953_v1 = vld [vmem:[%s1335_s5 + $0x20] sm:$0xff]  ;;  %v951_v9 = vld [vmem:[%s1335_s5 + $0x10] sm:$0xff]  ;;  %s1034_s28 = scalar_lea.hbm %s1033_s14, 128  ;;  %p1039_p0 = scmp.lt.s32.totalorder %s1033_s14, %s1337_s7 }
  0x1b   : > { %854 = vmatmul.msk.bf16.vlgmr.msra.gmra.mxu0 %vm357_vm0, %v931_v2  ;;  %p1035_p11 = scmp.ne.s32.totalorder %s1033_s14, %s1034_s28  ;;  %p1040_p1 = scmp.lt.s32.totalorder %s1038_s18, %s1034_s28 }
  0x1c   : > { %525 = vmatpush.bf16.msra.mxu1 %v946_v10 }
  0x1d   : > { %960 = vmatpush.bf16.msra.mxu3 %v946_v10  ;;  %p1036_p12 = pnand %p1035_p11, %p1162_p5  ;;  %p1041_p2 = por %p1040_p1, %p1039_p0 }
  0x1e   : > { %665 = vmatpush.bf16.msra.mxu2 %v955_v62 }
  0x1f   : > { %p1037_p13 = pneg %p1036_p12 }
  0x20   : > { %526 = vmatpush.bf16.msra.mxu1 %v945_v11 }
  0x21   : > { %961 = vmatpush.bf16.msra.mxu3 %v945_v11  ;;  %v950_v11 = vld [vmem:[%s1335_s5 + $0x8] sm:$0xff]  ;;  %p1042_p3 = pnand %p1041_p2, %p1037_p13 }
  0x22   : > { %666 = vmatpush.bf16.msra.mxu2 %v954_v0 }
  0x24   : > { %527 = vmatpush.bf16.msra.mxu1 %v944_v12 }
  0x25   : > { %962 = vmatpush.bf16.msra.mxu3 %v944_v12  ;;  %v949_v12 = vld [vmem:[%s1335_s5] sm:$0xff] }
  0x26   : > { %667 = vmatpush.bf16.msra.mxu2 %v953_v1 }
  0x28   : > { %528 = vmatpush.bf16.msra.mxu1 %v943_v14 }
  0x29   : > { %963 = vmatpush.bf16.msra.mxu3 %v943_v14 }
  0x2b   : > { %855 = vmatmul.msk.bf16.gmra.mxu0 %vm357_vm0, %v932_v3 }
  0x2c   : > { %529 = vmatpush.bf16.msra.mxu1 %v942_v15 }
  0x2d   : > { %964 = vmatpush.bf16.msra.mxu3 %v942_v15 }
  0x30   : > { %530 = vmatpush.bf16.msra.mxu1 %v941_v16 }
  0x31   : > { %965 = vmatpush.bf16.msra.mxu3 %v941_v16 }
  0x35   : > { %966 = vmatpush.bf16.msrb.mxu3 %v956_v58 }
  0x39   : > { %967 = vmatpush.bf16.msrb.mxu3 %v955_v62 }
  0x3b   : > { %856 = vmatmul.msk.bf16.gmra.mxu0 %vm357_vm0, %v933_v4 }
  0x3d   : > { %968 = vmatpush.bf16.msrb.mxu3 %v954_v0 }
  0x41   : > { %969 = vmatpush.bf16.msrb.mxu3 %v953_v1 }
  0x4b   : > { %857 = vmatmul.msk.bf16.gmra.mxu0 %vm357_vm0, %v934_v5  ;;  %v952_v5 = vld [vmem:[%s1335_s5 + $0x18] sm:$0xff] }
  0x4c   : > { %668 = vmatpush.bf16.msra.mxu2 %v952_v5  ;;  %970 = vmatpush.bf16.msrb.mxu3 %v952_v5 }
  0x50   : > { %669 = vmatpush.bf16.msra.mxu2 %v951_v9  ;;  %971 = vmatpush.bf16.msrb.mxu3 %v951_v9 }
  0x54   : > { %670 = vmatpush.bf16.msra.mxu2 %v950_v11  ;;  %972 = vmatpush.bf16.msrb.mxu3 %v950_v11 }
  0x58   : > { %671 = vmatpush.bf16.msra.mxu2 %v949_v12  ;;  %973 = vmatpush.bf16.msrb.mxu3 %v949_v12  ;;  %v1017_v12 = vld [vmem:[%s1336_s6] ss:$0 sm:$0xff] }
  0x5b   : > { %858 = vmatmul.msk.bf16.gmra.mxu0 %vm357_vm0, %v935_v6 }
  0x6b   : > { %859 = vmatmul.msk.bf16.gmra.mxu0 %vm357_vm0, %v936_v8 }
  0x7b   : > { %860 = vmatmul.msk.bf16.gmra.mxu0 %vm357_vm0, %v937_v13 }
  0x8b   : > { %861 = vmatmul.msk.bf16.gmra.mxu0 %vm357_vm0, %v938_v17 }
  0x98   : > { %v391_v18 = vpop.f32.mrf.mxu0 }
  0x99   : > { %v392_v20 = vadd.f32 %v1227_v19, %v391_v18 }
  0x9b   : > { %v431_v23 = vmax.f32 %v392_v20, 0.0 }
  0xa0   : > { %v393_v21 = vpop.f32.mrf.mxu0 }
  0xa1   : > { %v394_v22 = vadd.f32 %v1227_v19, %v393_v21  ;;  %v1016_v21 = vld [vmem:[%s1334_s4] ss:$0 sm:$0xff] }
  0xa3   : > { %v432_v24 = vmax.f32 %v394_v22, 0.0 }
  0xa5   : > { %v447_v25 = vpack.c.bf16 %v432_v24, %v431_v23 }
  0xa7   : > { %531 = vmatmul.bf16.vlgmr.msra.gmra.mxu1 %v447_v25 }
  0xa8   : > { %v396_v26 = vpop.f32.mrf.mxu0 }
  0xa9   : > { %v397_v27 = vadd.f32 %v1227_v19, %v396_v26 }
  0xab   : > { %v433_v30 = vmax.f32 %v397_v27, 0.0 }
  0xb0   : > { %v398_v28 = vpop.f32.mrf.mxu0 }
  0xb1   : > { %v399_v29 = vadd.f32 %v1227_v19, %v398_v28 }
  0xb3   : > { %v434_v31 = vmax.f32 %v399_v29, 0.0 }
  0xb5   : > { %v448_v32 = vpack.c.bf16 %v434_v31, %v433_v30 }
  0xb7   : > { %536 = vmatmul.bf16.gmra.mxu1 %v448_v32 }
  0xb8   : > { %v401_v33 = vpop.f32.mrf.mxu0 }
  0xb9   : > { %v402_v34 = vadd.f32 %v1227_v19, %v401_v33 }
  0xbb   : > { %v435_v37 = vmax.f32 %v402_v34, 0.0 }
  0xc0   : > { %v403_v35 = vpop.f32.mrf.mxu0 }
  0xc1   : > { %v404_v36 = vadd.f32 %v1227_v19, %v403_v35 }
  0xc3   : > { %v436_v38 = vmax.f32 %v404_v36, 0.0 }
  0xc5   : > { %v449_v39 = vpack.c.bf16 %v436_v38, %v435_v37 }
  0xc7   : > { %541 = vmatmul.bf16.gmra.mxu1 %v449_v39 }
  0xc8   : > { %v406_v40 = vpop.f32.mrf.mxu0 }
  0xc9   : > { %v407_v41 = vadd.f32 %v1227_v19, %v406_v40 }
  0xcb   : > { %v437_v44 = vmax.f32 %v407_v41, 0.0 }
  0xd0   : > { %v408_v42 = vpop.f32.mrf.mxu0 }
  0xd1   : > { %v409_v43 = vadd.f32 %v1227_v19, %v408_v42 }
  0xd3   : > { %v438_v45 = vmax.f32 %v409_v43, 0.0 }
  0xd5   : > { %v450_v46 = vpack.c.bf16 %v438_v45, %v437_v44 }
  0xd7   : > { %546 = vmatmul.bf16.gmra.mxu1 %v450_v46 }
  0xd8   : > { %v411_v47 = vpop.f32.mrf.mxu0 }
  0xd9   : > { %v412_v48 = vadd.f32 %v1227_v19, %v411_v47 }
  0xdb   : > { %v439_v51 = vmax.f32 %v412_v48, 0.0 }
  0xe0   : > { %v413_v49 = vpop.f32.mrf.mxu0 }
  0xe1   : > { %v414_v50 = vadd.f32 %v1227_v19, %v413_v49 }
  0xe3   : > { %v440_v52 = vmax.f32 %v414_v50, 0.0 }
  0xe5   : > { %v451_v53 = vpack.c.bf16 %v440_v52, %v439_v51 }
  0xe7   : > { %551 = vmatmul.bf16.gmra.mxu1 %v451_v53 }
  0xe8   : > { %v416_v54 = vpop.f32.mrf.mxu0 }
  0xe9   : > { %v417_v55 = vadd.f32 %v1227_v19, %v416_v54 }
  0xeb   : > { %v441_v59 = vmax.f32 %v417_v55, 0.0 }
  0xf0   : > { %v418_v56 = vpop.f32.mrf.mxu0 }
  0xf1   : > { %v419_v57 = vadd.f32 %v1227_v19, %v418_v56 }
  0xf3   : > { %v442_v60 = vmax.f32 %v419_v57, 0.0 }
  0xf5   : > { %v452_v61 = vpack.c.bf16 %v442_v60, %v441_v59 }
  0xf7   : > { %556 = vmatmul.bf16.gmra.mxu1 %v452_v61 }
  0xf8   : > { %v421_v63 = vpop.f32.mrf.mxu0 }
  0xf9   : > { %v422_v2 = vadd.f32 %v1227_v19, %v421_v63 }
  0xfb   : > { %v443_v6 = vmax.f32 %v422_v2, 0.0 }
 0x100   : > { %v423_v3 = vpop.f32.mrf.mxu0 }
 0x101   : > { %v424_v4 = vadd.f32 %v1227_v19, %v423_v3 }
 0x103   : > { %v444_v7 = vmax.f32 %v424_v4, 0.0 }
 0x105   : > { %v453_v8 = vpack.c.bf16 %v444_v7, %v443_v6 }
 0x107   : > { %561 = vmatmul.bf16.vlgmr.msra.gmra.mxu3 %v453_v8 }
 0x108   : > { %v426_v10 = vpop.f32.mrf.mxu0 }
 0x109   : > { %v427_v13 = vadd.f32 %v1227_v19, %v426_v10 }
 0x10b   : > { %v445_v16 = vmax.f32 %v427_v13, 0.0 }
 0x110   : > { %v428_v14 = vpop.f32.mrf.mxu0 }
 0x111   : > { %v429_v15 = vadd.f32 %v1227_v19, %v428_v14 }
 0x113   : > { %v446_v17 = vmax.f32 %v429_v15, 0.0 }
 0x115   : > { %v454_v18 = vpack.c.bf16 %v446_v17, %v445_v16 }
 0x117   : > { %566 = vmatmul.bf16.gmra.mxu3 %v454_v18 }
 0x124   : > { %v532_v20 = vpop.f32.mrf.mxu1 }
 0x125   : > { %v533_v22 = vadd.f32 %v1016_v21, %v532_v20 }
 0x127   : > { %v572_v25 = vmax.f32 %v533_v22, 0.0 }
 0x12c   : > { %v534_v23 = vpop.f32.mrf.mxu1 }
 0x12d   : > { %v535_v24 = vadd.f32 %v1016_v21, %v534_v23 }
 0x12f   : > { %v573_v26 = vmax.f32 %v535_v24, 0.0 }
 0x131   : > { %v588_v27 = vpack.c.bf16 %v573_v26, %v572_v25 }
 0x133   : > { %672 = vmatmul.bf16.vlgmr.msra.gmra.mxu2 %v588_v27 }
 0x134   : > { %v537_v28 = vpop.f32.mrf.mxu1 }
 0x135   : > { %v538_v29 = vadd.f32 %v1016_v21, %v537_v28 }
 0x137   : > { %v574_v31 = vmax.f32 %v538_v29, 0.0 }
 0x13c   : > { %v539_v30 = vpop.f32.mrf.mxu1 }
 0x13d   : > { %v540_v19 = vadd.f32 %v1016_v21, %v539_v30 }
 0x13f   : > { %v575_v32 = vmax.f32 %v540_v19, 0.0 }
 0x141   : > { %v589_v33 = vpack.c.bf16 %v575_v32, %v574_v31 }
 0x143   : > { %677 = vmatmul.bf16.gmra.mxu2 %v589_v33 }
 0x144   : > { %v542_v34 = vpop.f32.mrf.mxu1 }
 0x145   : > { %v543_v35 = vadd.f32 %v1016_v21, %v542_v34 }
 0x147   : > { %v576_v38 = vmax.f32 %v543_v35, 0.0 }
 0x14c   : > { %v544_v36 = vpop.f32.mrf.mxu1 }
 0x14d   : > { %v545_v37 = vadd.f32 %v1016_v21, %v544_v36 }
 0x14f   : > { %v577_v39 = vmax.f32 %v545_v37, 0.0 }
 0x151   : > { %v590_v40 = vpack.c.bf16 %v577_v39, %v576_v38 }
 0x153   : > { %682 = vmatmul.bf16.gmra.mxu2 %v590_v40 }
 0x154   : > { %v547_v41 = vpop.f32.mrf.mxu1 }
 0x155   : > { %v548_v42 = vadd.f32 %v1016_v21, %v547_v41 }
 0x157   : > { %v578_v45 = vmax.f32 %v548_v42, 0.0 }
 0x15c   : > { %v549_v43 = vpop.f32.mrf.mxu1 }
 0x15d   : > { %v550_v44 = vadd.f32 %v1016_v21, %v549_v43 }
 0x15f   : > { %v579_v46 = vmax.f32 %v550_v44, 0.0 }
 0x161   : > { %v591_v47 = vpack.c.bf16 %v579_v46, %v578_v45 }
 0x163   : > { %687 = vmatmul.bf16.gmra.mxu2 %v591_v47 }
 0x164   : > { %v552_v48 = vpop.f32.mrf.mxu1 }
 0x165   : > { %v553_v49 = vadd.f32 %v1016_v21, %v552_v48 }
 0x167   : > { %v580_v52 = vmax.f32 %v553_v49, 0.0 }
 0x16c   : > { %v554_v50 = vpop.f32.mrf.mxu1 }
 0x16d   : > { %v555_v51 = vadd.f32 %v1016_v21, %v554_v50 }
 0x16f   : > { %v581_v53 = vmax.f32 %v555_v51, 0.0 }
 0x171   : > { %v592_v54 = vpack.c.bf16 %v581_v53, %v580_v52 }
 0x173   : > { %692 = vmatmul.bf16.gmra.mxu2 %v592_v54 }
 0x174   : > { %v557_v55 = vpop.f32.mrf.mxu1 }
 0x175   : > { %v558_v56 = vadd.f32 %v1016_v21, %v557_v55 }
 0x177   : > { %v582_v59 = vmax.f32 %v558_v56, 0.0 }
 0x17c   : > { %v559_v57 = vpop.f32.mrf.mxu1 }
 0x17d   : > { %v560_v58 = vadd.f32 %v1016_v21, %v559_v57 }
 0x17f   : > { %v583_v60 = vmax.f32 %v560_v58, 0.0 }
 0x181   : > { %v593_v61 = vpack.c.bf16 %v583_v60, %v582_v59 }
 0x183   : > { %697 = vmatmul.bf16.gmra.mxu2 %v593_v61 }
 0x18a   : > { %v562_v62 = vpop.f32.mrf.mxu3 }
 0x18b   : > { %v563_v63 = vadd.f32 %v1016_v21, %v562_v62 }
 0x18d   : > { %v584_v2 = vmax.f32 %v563_v63, 0.0 }
 0x192   : > { %v564_v0 = vpop.f32.mrf.mxu3 }
 0x193   : > { %v565_v1 = vadd.f32 %v1016_v21, %v564_v0 }
 0x195   : > { %v585_v3 = vmax.f32 %v565_v1, 0.0 }
 0x197   : > { %v594_v4 = vpack.c.bf16 %v585_v3, %v584_v2 }
 0x199   : > { %702 = vmatmul.bf16.vlgmr.msrb.gmra.mxu3 %v594_v4 }
 0x19a   : > { %v567_v5 = vpop.f32.mrf.mxu3 }
 0x19b   : > { %v568_v6 = vadd.f32 %v1016_v21, %v567_v5 }
 0x19d   : > { %v586_v9 = vmax.f32 %v568_v6, 0.0 }
 0x1a2   : > { %v569_v7 = vpop.f32.mrf.mxu3 }
 0x1a3   : > { %v570_v8 = vadd.f32 %v1016_v21, %v569_v7 }
 0x1a5   : > { %v587_v10 = vmax.f32 %v570_v8, 0.0 }
 0x1a7   : > { %v595_v11 = vpack.c.bf16 %v587_v10, %v586_v9 }
 0x1a9   : > { %707 = vmatmul.bf16.gmra.mxu3 %v595_v11 }
 0x1b6   : > { %v673_v13 = vpop.f32.mrf.mxu2 }
 0x1b7   : > { %v674_v14 = vadd.f32 %v1017_v12, %v673_v13 }
 0x1b9   : > { %713 = vst [vmem:[%s1278_s20] sm:$0xff] %v674_v14 }
 0x1be   : > { %v675_v15 = vpop.f32.mrf.mxu2 }
 0x1bf   : > { %v676_v16 = vadd.f32 %v1017_v12, %v675_v15 }
 0x1c1   : > { %714 = vst [vmem:[%s1278_s20 + $0x8] sm:$0xff] %v676_v16 }
 0x1c6   : > { %v678_v17 = vpop.f32.mrf.mxu2 }
 0x1c7   : > { %v679_v18 = vadd.f32 %v1017_v12, %v678_v17 }
 0x1c9   : > { %715 = vst [vmem:[%s1278_s20 + $0x10] sm:$0xff] %v679_v18 }
 0x1ce   : > { %v680_v20 = vpop.f32.mrf.mxu2 }
 0x1cf   : > { %v681_v21 = vadd.f32 %v1017_v12, %v680_v20 }
 0x1d1   : > { %716 = vst [vmem:[%s1278_s20 + $0x18] sm:$0xff] %v681_v21 }
 0x1d6   : > { %v683_v22 = vpop.f32.mrf.mxu2 }
 0x1d7   : > { %v684_v23 = vadd.f32 %v1017_v12, %v683_v22 }
 0x1d9   : > { %717 = vst [vmem:[%s1278_s20 + $0x20] sm:$0xff] %v684_v23 }
 0x1de   : > { %v685_v24 = vpop.f32.mrf.mxu2 }
 0x1df   : > { %v686_v25 = vadd.f32 %v1017_v12, %v685_v24 }
 0x1e1   : > { %718 = vst [vmem:[%s1278_s20 + $0x28] sm:$0xff] %v686_v25 }
 0x1e6   : > { %v688_v26 = vpop.f32.mrf.mxu2 }
 0x1e7   : > { %v689_v27 = vadd.f32 %v1017_v12, %v688_v26 }
 0x1e9   : > { %719 = vst [vmem:[%s1278_s20 + $0x30] sm:$0xff] %v689_v27 }
 0x1ee   : > { %v690_v28 = vpop.f32.mrf.mxu2 }
 0x1ef   : > { %v691_v29 = vadd.f32 %v1017_v12, %v690_v28 }
 0x1f1   : > { %720 = vst [vmem:[%s1278_s20 + $0x38] sm:$0xff] %v691_v29 }
 0x1f6   : > { %v693_v30 = vpop.f32.mrf.mxu2 }
 0x1f7   : > { %v694_v19 = vadd.f32 %v1017_v12, %v693_v30 }
 0x1f9   : > { %721 = vst [vmem:[%s1278_s20 + $0x40] sm:$0xff] %v694_v19 }
 0x1fe   : > { %v695_v31 = vpop.f32.mrf.mxu2 }
 0x1ff   : > { %v696_v32 = vadd.f32 %v1017_v12, %v695_v31 }
 0x201   : > { %722 = vst [vmem:[%s1278_s20 + $0x48] sm:$0xff] %v696_v32 }
 0x206   : > { %v698_v33 = vpop.f32.mrf.mxu2 }
 0x207   : > { %v699_v34 = vadd.f32 %v1017_v12, %v698_v33 }
 0x209   : > { %723 = vst [vmem:[%s1278_s20 + $0x50] sm:$0xff] %v699_v34 }
 0x20e   : > { %v700_v35 = vpop.f32.mrf.mxu2 }
 0x20f   : > { %v701_v36 = vadd.f32 %v1017_v12, %v700_v35 }
 0x211   : > { %724 = vst [vmem:[%s1278_s20 + $0x58] sm:$0xff] %v701_v36 }
 0x21c   : > { %v703_v37 = vpop.f32.mrf.mxu3 }
 0x21d   : > { %v704_v38 = vadd.f32 %v1017_v12, %v703_v37 }
 0x21f   : > { %725 = vst [vmem:[%s1278_s20 + $0x60] sm:$0xff] %v704_v38 }
 0x224   : > { %v705_v39 = vpop.f32.mrf.mxu3 }
 0x225   : > { %v706_v40 = vadd.f32 %v1017_v12, %v705_v39 }
 0x227   : > { %726 = vst [vmem:[%s1278_s20 + $0x68] sm:$0xff] %v706_v40 }
 0x22c   : > { %v708_v41 = vpop.f32.mrf.mxu3 }
 0x22d   : > { %v709_v42 = vadd.f32 %v1017_v12, %v708_v41 }
 0x22f   : > { %727 = vst [vmem:[%s1278_s20 + $0x70] sm:$0xff] %v709_v42 }
 0x234   : > { %v710_v43 = vpop.f32.mrf.mxu3 }
 0x235   : > { %v711_v44 = vadd.f32 %v1017_v12, %v710_v43 }
 0x237   : > { %728 = vst [vmem:[%s1278_s20 + $0x78] sm:$0xff] %v711_v44 }
 0x238   : > { %1045 = shalt.err (!%p1042_p3)
}
 0x239   : > { %s1082_s16 = smov 128   ;;  %s1083_s20 = smov 8  }
 0x23a   : > { %974 = dma.vmem_to_hbm [thread:$0]  (%p1162_p5), %s743_s9, 2048, %s745_s21, %s730_s13, %s1082_s16, %s1082_s16, %s1083_s20  }
 0x23b PF: > { %p980_p4 = scmp.ge.s32.totalorder %s1080_s27, 2  ;;  %s759_s23 = sand.u32 1, %s1068_s24  }
 0x23c   : > { %s760_s29 = scalar_lea.sflag [#allocation3], %s759_s23 }
 0x23d   : > { %p977_p7 = pnand %p980_p4, %p1166_p6 }
 0x23f   : > { %p978_p8 = pneg %p977_p7 }
 0x241   : > { %1063 = dma.done.wait (%p978_p8), %s760_s29, 2048  }
 0x242   : > { %1065 = vsyncadd (%p978_p8), %s760_s29, 4294965248  ;;  %p17_p9 = scmp.ge.s32.totalorder %s1149_s30, 4   ;;  %s1340_s24 = smov %s1072_s25 }
 0x243   : > { %s1341_s25 = smov %s1076_s26  ;;  %s1342_s26 = smov %s1160_s10 }
 0x244   : > { %s1343_s27 = smov %s1149_s30  ;;  %19 = sbr.rel (!%p17_p9) target bundleno = 3 (0x3), region = 83 }
 0x249   :  { %766 = vsyncpa [#allocation3], 1 }
 0x24a   :  { %768 = vsyncpa [#allocation3 + $0x1], 1 }

</bundles_post_ra>
